<compile_context>
chip_gen: v7x
topology: tpu7x:2x2x1
jax: 0.10.0
libtpu: 0.0.40
codegen_flags: <defaults>
</compile_context>

<pallas_src>
import functools
import math

import numpy as np
import jax
import jax.numpy as jnp
from jax import lax
from jax.experimental import pallas as pl
from jax.experimental.pallas import tpu as pltpu

N_QUBITS = 4
Q_DEPTH = 10
Q_DELTA = 0.01
NUM_CLASSES = 5
DIM = 2 ** N_QUBITS  # 16


def _round_up(a, b):
    return (a + b - 1) // b * b


# --------------------------------------------------------------------------
# Parameter-independent constants (numpy, built once at import).
# Wire 0 is the most-significant bit of the 16-dim basis index (PennyLane
# default.qubit convention).
# --------------------------------------------------------------------------
def _cnot_perm_np(control, target):
    p = np.zeros((DIM, DIM), dtype=np.float64)
    for i in range(DIM):
        bits = [(i >> (N_QUBITS - 1 - q)) & 1 for q in range(N_QUBITS)]
        out = list(bits)
        if bits[control] == 1:
            out[target] ^= 1
        j = 0
        for q in range(N_QUBITS):
            j = (j << 1) | out[q]
        p[j, i] = 1.0
    return p


def _entangling_np():
    # CNOT(0,1), CNOT(2,3), then CNOT(1,2), applied to the state in that order.
    return _cnot_perm_np(1, 2) @ _cnot_perm_np(2, 3) @ _cnot_perm_np(0, 1)


def _zsign_np():
    """(16, 4) PauliZ eigenvalues: +1 if bit_j(i)==0 else -1."""
    z = np.zeros((DIM, N_QUBITS), dtype=np.float64)
    for i in range(DIM):
        for j in range(N_QUBITS):
            z[i, j] = 1.0 - 2.0 * ((i >> (N_QUBITS - 1 - j)) & 1)
    return z


def _selection_mats_np():
    """One-hot matrices for the two-stage Kronecker state build.

    amp rows: 0..3 = amp0[qubit 0..3], 4..7 = amp1[qubit 0..3].
      ab   = (S0 @ amp) * (S1 @ amp)   -> rows 0..3: a4[p] (qubits 0,1),
                                          rows 4..7: b4[q] (qubits 2,3)
      state= (EA @ ab)  * (EB @ ab)    -> state[i] = a4[i>>2] * b4[i&3]
    """
    s0 = np.zeros((8, 8), dtype=np.float32)
    s1 = np.zeros((8, 8), dtype=np.float32)
    for p in range(4):                              # qubits 0,1; p = 2*b0 + b1
        s0[p, 4 * ((p >> 1) & 1) + 0] = 1.0
        s1[p, 4 * (p & 1) + 1] = 1.0
    for q in range(4):                              # qubits 2,3; q = 2*b2 + b3
        s0[4 + q, 4 * ((q >> 1) & 1) + 2] = 1.0
        s1[4 + q, 4 * (q & 1) + 3] = 1.0
    ea = np.zeros((DIM, 8), dtype=np.float32)
    eb = np.zeros((DIM, 8), dtype=np.float32)
    for i in range(DIM):
        ea[i, i >> 2] = 1.0
        eb[i, 4 + (i & 3)] = 1.0
    return s0, s1, ea, eb


_ENT_NP = _entangling_np()
_ZSIGN_NP = _zsign_np()
_S0_NP, _S1_NP, _EA_NP, _EB_NP = _selection_mats_np()
_PHASE_NP = np.concatenate(
    [np.full((N_QUBITS, 1), math.pi / 4.0, np.float32),
     np.full((N_QUBITS, 1), -math.pi / 4.0, np.float32)], axis=0)     # (8, 1)

_S0 = jnp.asarray(_S0_NP)
_S1 = jnp.asarray(_S1_NP)
_EA = jnp.asarray(_EA_NP)
_EB = jnp.asarray(_EB_NP)
_PHASE = jnp.asarray(_PHASE_NP)


# --------------------------------------------------------------------------
# Parameter folding (pure jnp: jittable, no device->host sync, can be hoisted
# out of the per-call path and reused across forward calls).
# --------------------------------------------------------------------------
def _ry2_jnp(theta):
    c = jnp.cos(theta * 0.5)
    s = jnp.sin(theta * 0.5)
    return jnp.stack([jnp.stack([c, -s]), jnp.stack([s, c])])


def fold_params(w_pre, b_pre, q_params, w_post, b_post):
    """Fold all parameter-only math.  Call once per parameter update."""
    w_pre = jnp.asarray(w_pre, jnp.float32).reshape(N_QUBITS, 8)
    b_pre = jnp.asarray(b_pre, jnp.float32).reshape(N_QUBITS)
    w_post = jnp.asarray(w_post, jnp.float32).reshape(NUM_CLASSES, N_QUBITS)
    b_post = jnp.asarray(b_post, jnp.float32).reshape(NUM_CLASSES)
    q_w = jnp.asarray(q_params, jnp.float32).reshape(Q_DEPTH, N_QUBITS)

    # Fold all 10 layers:  M = L_9 @ ... @ L_0,  L_k = RY16(w_k) @ ENT.
    ent = jnp.asarray(_ENT_NP, jnp.float32)
    m = jnp.eye(DIM, dtype=jnp.float32)
    for k in range(Q_DEPTH):
        layer = _ry2_jnp(q_w[k, 0])
        for j in range(1, N_QUBITS):
            layer = jnp.kron(layer, _ry2_jnp(q_w[k, j]))
        m = layer @ (ent @ m)

    # Fold PauliZ readout into post_net:  W_out = w_post @ zsign^T  -> (5, 16)
    w_out = w_post @ jnp.asarray(_ZSIGN_NP, jnp.float32).T

    return dict(
        w_pre8=jnp.concatenate([w_pre, w_pre], axis=0),               # (8, 8)
        b_pre8=jnp.concatenate([b_pre, b_pre]).reshape(2 * N_QUBITS, 1),
        m=m,                                                          # (16, 16)
        w_out=w_out,                                                  # (5, 16)
        b_post=b_post.reshape(NUM_CLASSES, 1),
    )


# --------------------------------------------------------------------------
# Pallas kernel — batch on the lane (last, 128-wide) axis.
#   x_ref       (TB, 8) batch-major  [or (8, TB) on the fallback path]
#   w_pre8_ref  (8, 8)   pre_net weight stacked twice
#   b_pre8_ref  (8, 1)   pre_net bias stacked twice
#   phase_ref   (8, 1)   +pi/4 rows 0..3, -pi/4 rows 4..7
#   s0/s1_ref   (8, 8)   one-hot qubit-pair selections
#   ea/eb_ref   (16, 8)  one-hot Kronecker expansions
#   m_ref       (16, 16) fused 10-layer circuit matrix
#   w_out_ref   (5, 16)  fused PauliZ + post_net weight
#   b_post_ref  (5, 1)   post_net bias
#   out_ref     (5, TB)  logits (batch on lanes)
# --------------------------------------------------------------------------
def dressed_qnet_kernel(x_ref, w_pre8_ref, b_pre8_ref, phase_ref,
                        s0_ref, s1_ref, ea_ref, eb_ref,
                        m_ref, w_out_ref, b_post_ref, out_ref,
                        *, x_batch_major):
    if x_batch_major:
        # pre_net, contracting the feature (minor) dim of both operands
        # ('kf,bf->kb') so no wrapper-side transpose of x is needed.
        pre8 = lax.dot_general(
            w_pre8_ref[...], x_ref[...],
            (((1,), (1,)), ((), ())),
            preferred_element_type=jnp.float32)                     # (8, TB)
    else:
        pre8 = jnp.dot(w_pre8_ref[...], x_ref[...],
                       preferred_element_type=jnp.float32)          # (8, TB)
    pre8 = pre8 + b_pre8_ref[...]

    # q_in = tanh(pre) * pi/2 ; h = q_in/2.
    # amp0 = cos(h + pi/4), amp1 = cos(h - pi/4)  (== (cos h -/+ sin h)/sqrt2)
    amp = jnp.cos(jnp.tanh(pre8) * (jnp.pi * 0.25) + phase_ref[...])  # (8, TB)

    # Two-stage Kronecker initial-state build (H + RY product state).
    ab = (jnp.dot(s0_ref[...], amp, preferred_element_type=jnp.float32)
          * jnp.dot(s1_ref[...], amp, preferred_element_type=jnp.float32))
    state = (jnp.dot(ea_ref[...], ab, preferred_element_type=jnp.float32)
             * jnp.dot(eb_ref[...], ab, preferred_element_type=jnp.float32))

    # All 10 variational layers in one matmul (folded on the parameter side).
    state = jnp.dot(m_ref[...], state,
                    preferred_element_type=jnp.float32)              # (16, TB)

    # PauliZ expvals + post_net folded into one (5, 16) matmul.
    probs = state * state
    out = jnp.dot(w_out_ref[...], probs,
                  preferred_element_type=jnp.float32) + b_post_ref[...]
    out_ref[...] = out.astype(out_ref.dtype)                         # (5, TB)


def _forward(x, folded, block_batch, batch_major):
    x = jnp.asarray(x, jnp.float32)
    batch = x.shape[0]

    # Tile selection:
    #  * large tiles amortize the ~0.35us per-grid-step overhead
    #    (sweep block_batch up to 32768/65536 on v6e's 128MiB VMEM),
    #  * keep >=2 grid steps so v7x's two TensorCores both get work,
    #  * TB=16384 keeps worst-case per-tile VMEM ~22MiB (< v7x's 64MiB).
    bmax = _round_up(batch, 128)
    tb = min(_round_up(max(block_batch, 128), 128), bmax)
    if bmax >= 2 * 128:
        tb = min(tb, _round_up(-(-batch // 2), 128))
    bp = _round_up(batch, tb)

    if batch_major:
        xin = x if bp == batch else jnp.pad(x, ((0, bp - batch), (0, 0)))
        x_spec = pl.BlockSpec((tb, 8), lambda i: (i, 0))
    else:
        # Fallback layout: features on sublanes, batch on lanes (pre-transposed
        # in the wrapper — costs one extra XLA pass over x).
        xin = jnp.pad(x.T, ((0, 0), (0, bp - batch)))
        x_spec = pl.BlockSpec((8, tb), lambda i: (0, i))

    def cspec(shape):  # parameter arrays stay VMEM-resident across the grid
        return pl.BlockSpec(shape, lambda i: (0, 0))

    kernel = functools.partial(dressed_qnet_kernel, x_batch_major=batch_major)
    out_t = pl.pallas_call(
        kernel,
        out_shape=jax.ShapeDtypeStruct((NUM_CLASSES, bp), jnp.float32),
        grid_spec=pltpu.PrefetchScalarGridSpec(
            num_scalar_prefetch=0,
            grid=(bp // tb,),
            in_specs=[
                x_spec,
                cspec((2 * N_QUBITS, 8)),            # w_pre8
                cspec((2 * N_QUBITS, 1)),            # b_pre8
                cspec((2 * N_QUBITS, 1)),            # phase
                cspec((2 * N_QUBITS, 2 * N_QUBITS)),  # S0
                cspec((2 * N_QUBITS, 2 * N_QUBITS)),  # S1
                cspec((DIM, 2 * N_QUBITS)),          # EA
                cspec((DIM, 2 * N_QUBITS)),          # EB
                cspec((DIM, DIM)),                   # fused circuit
                cspec((NUM_CLASSES, DIM)),           # fused readout
                cspec((NUM_CLASSES, 1)),             # b_post
            ],
            out_specs=pl.BlockSpec((NUM_CLASSES, tb), lambda i: (0, i)),
        ),
        compiler_params=pltpu.CompilerParams(
            dimension_semantics=("parallel",),
            vmem_limit_bytes=48 * 1024 * 1024),
    )(xin, folded["w_pre8"], folded["b_pre8"], _PHASE, _S0, _S1, _EA, _EB,
      folded["m"], folded["w_out"], folded["b_post"])

    # Drop padded tail columns, return batch-major (B, NUM_CLASSES).
    # (Kept lane-dense (5, bp) in the kernel; a (B, 5) in-kernel store would be
    # lane-sparse and slower than this tiny XLA transpose.)
    return out_t[:, :batch].T


# One-time probe: prefer the batch-major-x kernel (no wrapper transpose/pad
# pass over x); fall back to the pre-transposed layout if the trans_b matmul
# pattern does not lower on the installed Mosaic.
_X_BATCH_MAJOR = None


def dressed_qnet_folded(x, folded, *, block_batch=16384):
    """x: (B, 8) float32, folded: output of fold_params. Returns (B, 5)."""
    global _X_BATCH_MAJOR
    if _X_BATCH_MAJOR is None:
        try:
            out = _forward(x, folded, block_batch, batch_major=True)
            jax.block_until_ready(out)
            _X_BATCH_MAJOR = True
            return out
        except Exception:
            _X_BATCH_MAJOR = False
    return _forward(x, folded, block_batch, batch_major=_X_BATCH_MAJOR)


def dressed_qnet(x, w_pre, b_pre, q_params, w_post, b_post, *,
                 block_batch=16384):
    """Convenience wrapper: folds parameters then runs the kernel."""
    folded = fold_params(w_pre, b_pre, q_params, w_post, b_post)
    return dressed_qnet_folded(x, folded, block_batch=block_batch)


# --------------------------------------------------------------------------
# References for correctness checks.
# --------------------------------------------------------------------------
def reference_fused_jnp(x, folded):
    """Plain-JAX mirror of the fused kernel math (row-major layout)."""
    x = jnp.asarray(x, jnp.float32)
    pre = x @ folded["w_pre8"][:N_QUBITS].T + folded["b_pre8"][:N_QUBITS, 0]
    h = jnp.tanh(pre) * (jnp.pi * 0.25)
    amp0 = jnp.cos(h + jnp.pi / 4.0)                                # (B, 4)
    amp1 = jnp.cos(h - jnp.pi / 4.0)
    bits = ((np.arange(DIM)[:, None]
             >> (N_QUBITS - 1 - np.arange(N_QUBITS)[None, :])) & 1)  # (16, 4)
    state = jnp.ones((x.shape[0], DIM), jnp.float32)
    for j in range(N_QUBITS):
        aj = jnp.where(bits[None, :, j] == 0, amp0[:, j:j + 1], amp1[:, j:j + 1])
        state = state * aj
    state = state @ folded["m"].T
    probs = state * state
    return probs @ folded["w_out"].T + folded["b_post"][:, 0]


def _ry2_np(theta):
    c = np.cos(theta / 2.0)
    s = np.sin(theta / 2.0)
    return np.array([[c, -s], [s, c]], dtype=np.float64)


def _ry_layer_np(w):
    m = _ry2_np(w[0])
    for j in range(1, N_QUBITS):
        m = np.kron(m, _ry2_np(w[j]))
    return m


def reference_exact(x, w_pre, b_pre, q_params, w_post, b_post):
    """Exact float64, fully unfused per-sample simulation (numpy)."""
    x = np.asarray(x, np.float64)
    w_pre = np.asarray(w_pre, np.float64)
    b_pre = np.asarray(b_pre, np.float64).reshape(-1)
    w_post = np.asarray(w_post, np.float64)
    b_post = np.asarray(b_post, np.float64).reshape(-1)
    q_w = np.asarray(q_params, np.float64).reshape(Q_DEPTH, N_QUBITS)

    pre = x @ w_pre.T + b_pre
    q_in = np.tanh(pre) * (np.pi / 2.0)
    c = np.cos(q_in / 2.0)
    s = np.sin(q_in / 2.0)
    amp0 = (c - s) / np.sqrt(2.0)
    amp1 = (c + s) / np.sqrt(2.0)

    out = np.zeros((x.shape[0], NUM_CLASSES), dtype=np.float64)
    for b in range(x.shape[0]):
        state = np.ones(1, dtype=np.float64)
        for j in range(N_QUBITS):
            state = np.kron(state, np.array([amp0[b, j], amp1[b, j]]))
        for k in range(Q_DEPTH):
            state = _ry_layer_np(q_w[k]) @ (_ENT_NP @ state)
        q_out = (state * state) @ _ZSIGN_NP
        out[b] = w_post @ q_out + b_post
    return out


if __name__ == "__main__":
    key = jax.random.PRNGKey(0)
    k_x, k_qp, k_wpre, k_bpre, k_wpost, k_bpost, k_x2 = jax.random.split(key, 7)

    batch = 8
    x = jax.random.normal(k_x, (batch, 8), dtype=jnp.float32)

    # Deterministic parameter init (shapes from the module's __init__).
    q_params = Q_DELTA * jax.random.normal(k_qp, (Q_DEPTH * N_QUBITS,),
                                           dtype=jnp.float32)
    w_pre = 0.1 * jax.random.normal(k_wpre, (N_QUBITS, 8), dtype=jnp.float32)
    b_pre = 0.1 * jax.random.normal(k_bpre, (N_QUBITS,), dtype=jnp.float32)
    w_post = 0.1 * jax.random.normal(k_wpost, (NUM_CLASSES, N_QUBITS),
                                     dtype=jnp.float32)
    b_post = 0.1 * jax.random.normal(k_bpost, (NUM_CLASSES,), dtype=jnp.float32)

    # Folds are hoisted out of the per-call path (pure jnp, jittable).
    folded = fold_params(w_pre, b_pre, q_params, w_post, b_post)

    out = jax.block_until_ready(dressed_qnet_folded(x, folded))
    assert out.shape == (batch, NUM_CLASSES)

    # Tight check: structure-matching JAX reference using the same fused mats.
    ref_t = reference_fused_jnp(x, folded)
    np.testing.assert_allclose(np.asarray(out), np.asarray(ref_t),
                               rtol=1e-4, atol=1e-5)

    # Algebraic-fold sanity check: exact float64 unfused simulation.  Loose
    # tolerance only for f32 folds / MXU accumulation; a wrong fold or wire
    # ordering would be off by O(0.1).
    ref_e = reference_exact(x, w_pre, b_pre, q_params, w_post, b_post)
    np.testing.assert_allclose(np.asarray(out), ref_e, rtol=5e-3, atol=5e-3)

    # Exercise the multi-tile grid + padding path (B not a multiple of 128 and
    # not a multiple of the tile): batch=200 -> tb=128, grid of 2, padded 256.
    batch2 = 200
    x2 = jax.random.normal(k_x2, (batch2, 8), dtype=jnp.float32)
    out2 = jax.block_until_ready(
        dressed_qnet(x2, w_pre, b_pre, q_params, w_post, b_post))
    ref2 = reference_fused_jnp(x2, folded)
    np.testing.assert_allclose(np.asarray(out2), np.asarray(ref2),
                               rtol=1e-4, atol=1e-5)

    print("KERNEL_OK")
</pallas_src>

<mosaic_0001>
module attributes {stable_mosaic.version = 11 : i64} {
  func.func @dressed_qnet_kernel(%arg0: i32, %arg1: memref<128x8xf32, #tpu.memory_space<vmem>>, %arg2: memref<8x8xf32, #tpu.memory_space<vmem>>, %arg3: memref<8x1xf32, #tpu.memory_space<vmem>>, %arg4: memref<8x1xf32, #tpu.memory_space<vmem>>, %arg5: memref<8x8xf32, #tpu.memory_space<vmem>>, %arg6: memref<8x8xf32, #tpu.memory_space<vmem>>, %arg7: memref<16x8xf32, #tpu.memory_space<vmem>>, %arg8: memref<16x8xf32, #tpu.memory_space<vmem>>, %arg9: memref<16x16xf32, #tpu.memory_space<vmem>>, %arg10: memref<5x16xf32, #tpu.memory_space<vmem>>, %arg11: memref<5x1xf32, #tpu.memory_space<vmem>>, %arg12: memref<5x128xf32, #tpu.memory_space<vmem>>) attributes {dimension_semantics = [#tpu.dimension_semantics<parallel>], iteration_bounds = array<i64: 1>, scalar_prefetch = 0 : i64, scratch_operands = 0 : i64, tpu.core_type = #tpu.core_type<tc>, window_params = [{transform_indices = @transform_0, window_bounds = array<i64: 128, 8>}, {pipeline_mode = #tpu.pipeline_mode<synchronous>, transform_indices = @transform_1, window_bounds = array<i64: 8, 8>}, {pipeline_mode = #tpu.pipeline_mode<synchronous>, transform_indices = @transform_2, window_bounds = array<i64: 8, 1>}, {pipeline_mode = #tpu.pipeline_mode<synchronous>, transform_indices = @transform_3, window_bounds = array<i64: 8, 1>}, {pipeline_mode = #tpu.pipeline_mode<synchronous>, transform_indices = @transform_4, window_bounds = array<i64: 8, 8>}, {pipeline_mode = #tpu.pipeline_mode<synchronous>, transform_indices = @transform_5, window_bounds = array<i64: 8, 8>}, {pipeline_mode = #tpu.pipeline_mode<synchronous>, transform_indices = @transform_6, window_bounds = array<i64: 16, 8>}, {pipeline_mode = #tpu.pipeline_mode<synchronous>, transform_indices = @transform_7, window_bounds = array<i64: 16, 8>}, {pipeline_mode = #tpu.pipeline_mode<synchronous>, transform_indices = @transform_8, window_bounds = array<i64: 16, 16>}, {pipeline_mode = #tpu.pipeline_mode<synchronous>, transform_indices = @transform_9, window_bounds = array<i64: 5, 16>}, {pipeline_mode = #tpu.pipeline_mode<synchronous>, transform_indices = @transform_10, window_bounds = array<i64: 5, 1>}, {transform_indices = @transform_11, window_bounds = array<i64: 5, 128>}]} {
    %c0 = arith.constant 0 : index
    %c0_0 = arith.constant 0 : index
    %0 = vector.load %arg2[%c0, %c0_0] : memref<8x8xf32, #tpu.memory_space<vmem>>, vector<8x8xf32>
    %c0_1 = arith.constant 0 : index
    %c0_2 = arith.constant 0 : index
    %1 = vector.load %arg1[%c0_1, %c0_2] : memref<128x8xf32, #tpu.memory_space<vmem>>, vector<128x8xf32>
    %cst = arith.constant dense<0.000000e+00> : vector<8x128xf32>
    %2 = tpu.matmul %0, %1, %cst {dimension_numbers = #tpu.dot_dimension_numbers<[1], [1], [0], [0], [0, 0, 1, 0], [], []>} : vector<8x8xf32>, vector<128x8xf32>, vector<8x128xf32> -> vector<8x128xf32>
    %c0_3 = arith.constant 0 : index
    %c0_4 = arith.constant 0 : index
    %3 = vector.load %arg3[%c0_3, %c0_4] : memref<8x1xf32, #tpu.memory_space<vmem>>, vector<8x1xf32>
    %4 = vector.broadcast %3 : vector<8x1xf32> to vector<8x128xf32>
    %5 = arith.addf %2, %4 : vector<8x128xf32>
    %6 = math.tanh %5 : vector<8x128xf32>
    %cst_5 = arith.constant 0.785398185 : f32
    %7 = vector.broadcast %cst_5 : f32 to vector<8x128xf32>
    %8 = arith.mulf %6, %7 : vector<8x128xf32>
    %c0_6 = arith.constant 0 : index
    %c0_7 = arith.constant 0 : index
    %9 = vector.load %arg4[%c0_6, %c0_7] : memref<8x1xf32, #tpu.memory_space<vmem>>, vector<8x1xf32>
    %10 = vector.broadcast %9 : vector<8x1xf32> to vector<8x128xf32>
    %11 = arith.addf %8, %10 : vector<8x128xf32>
    %12 = math.cos %11 : vector<8x128xf32>
    %c0_8 = arith.constant 0 : index
    %c0_9 = arith.constant 0 : index
    %13 = vector.load %arg5[%c0_8, %c0_9] : memref<8x8xf32, #tpu.memory_space<vmem>>, vector<8x8xf32>
    %cst_10 = arith.constant dense<0.000000e+00> : vector<8x128xf32>
    %14 = tpu.matmul %13, %12, %cst_10 {dimension_numbers = #tpu.dot_dimension_numbers<[1], [0], [0], [1], [0, 0, 1, 1], [], []>} : vector<8x8xf32>, vector<8x128xf32>, vector<8x128xf32> -> vector<8x128xf32>
    %c0_11 = arith.constant 0 : index
    %c0_12 = arith.constant 0 : index
    %15 = vector.load %arg6[%c0_11, %c0_12] : memref<8x8xf32, #tpu.memory_space<vmem>>, vector<8x8xf32>
    %cst_13 = arith.constant dense<0.000000e+00> : vector<8x128xf32>
    %16 = tpu.matmul %15, %12, %cst_13 {dimension_numbers = #tpu.dot_dimension_numbers<[1], [0], [0], [1], [0, 0, 1, 1], [], []>} : vector<8x8xf32>, vector<8x128xf32>, vector<8x128xf32> -> vector<8x128xf32>
    %17 = arith.mulf %14, %16 : vector<8x128xf32>
    %c0_14 = arith.constant 0 : index
    %c0_15 = arith.constant 0 : index
    %18 = vector.load %arg7[%c0_14, %c0_15] : memref<16x8xf32, #tpu.memory_space<vmem>>, vector<16x8xf32>
    %cst_16 = arith.constant dense<0.000000e+00> : vector<16x128xf32>
    %19 = tpu.matmul %18, %17, %cst_16 {dimension_numbers = #tpu.dot_dimension_numbers<[1], [0], [0], [1], [0, 0, 1, 1], [], []>} : vector<16x8xf32>, vector<8x128xf32>, vector<16x128xf32> -> vector<16x128xf32>
    %c0_17 = arith.constant 0 : index
    %c0_18 = arith.constant 0 : index
    %20 = vector.load %arg8[%c0_17, %c0_18] : memref<16x8xf32, #tpu.memory_space<vmem>>, vector<16x8xf32>
    %cst_19 = arith.constant dense<0.000000e+00> : vector<16x128xf32>
    %21 = tpu.matmul %20, %17, %cst_19 {dimension_numbers = #tpu.dot_dimension_numbers<[1], [0], [0], [1], [0, 0, 1, 1], [], []>} : vector<16x8xf32>, vector<8x128xf32>, vector<16x128xf32> -> vector<16x128xf32>
    %22 = arith.mulf %19, %21 : vector<16x128xf32>
    %c0_20 = arith.constant 0 : index
    %c0_21 = arith.constant 0 : index
    %23 = vector.load %arg9[%c0_20, %c0_21] : memref<16x16xf32, #tpu.memory_space<vmem>>, vector<16x16xf32>
    %cst_22 = arith.constant dense<0.000000e+00> : vector<16x128xf32>
    %24 = tpu.matmul %23, %22, %cst_22 {dimension_numbers = #tpu.dot_dimension_numbers<[1], [0], [0], [1], [0, 0, 1, 1], [], []>} : vector<16x16xf32>, vector<16x128xf32>, vector<16x128xf32> -> vector<16x128xf32>
    %25 = arith.mulf %24, %24 : vector<16x128xf32>
    %c0_23 = arith.constant 0 : index
    %c0_24 = arith.constant 0 : index
    %26 = vector.load %arg10[%c0_23, %c0_24] : memref<5x16xf32, #tpu.memory_space<vmem>>, vector<5x16xf32>
    %cst_25 = arith.constant dense<0.000000e+00> : vector<5x128xf32>
    %27 = tpu.matmul %26, %25, %cst_25 {dimension_numbers = #tpu.dot_dimension_numbers<[1], [0], [0], [1], [0, 0, 1, 1], [], []>} : vector<5x16xf32>, vector<16x128xf32>, vector<5x128xf32> -> vector<5x128xf32>
    %c0_26 = arith.constant 0 : index
    %c0_27 = arith.constant 0 : index
    %28 = vector.load %arg11[%c0_26, %c0_27] : memref<5x1xf32, #tpu.memory_space<vmem>>, vector<5x1xf32>
    %29 = vector.broadcast %28 : vector<5x1xf32> to vector<5x128xf32>
    %30 = arith.addf %27, %29 : vector<5x128xf32>
    %c0_28 = arith.constant 0 : index
    %c0_29 = arith.constant 0 : index
    %31 = vector.load %arg12[%c0_28, %c0_29] : memref<5x128xf32, #tpu.memory_space<vmem>>, vector<5x128xf32>
    tpu.vector_store %arg12[%c0_28, %c0_29], %30 {strides = array<i32>} : memref<5x128xf32, #tpu.memory_space<vmem>>, vector<5x128xf32>,
    return
  }
  func.func @transform_0(%arg0: i32) -> (i32, i32) {
    %c0_i32 = arith.constant 0 : i32
    %c0_i32_0 = arith.constant 0 : i32
    return %arg0, %c0_i32 : i32, i32
  }
  func.func @transform_1(%arg0: i32) -> (i32, i32) {
    %c0_i32 = arith.constant 0 : i32
    %c0_i32_0 = arith.constant 0 : i32
    %c0_i32_1 = arith.constant 0 : i32
    return %c0_i32, %c0_i32_0 : i32, i32
  }
  func.func @transform_2(%arg0: i32) -> (i32, i32) {
    %c0_i32 = arith.constant 0 : i32
    %c0_i32_0 = arith.constant 0 : i32
    %c0_i32_1 = arith.constant 0 : i32
    return %c0_i32, %c0_i32_0 : i32, i32
  }
  func.func @transform_3(%arg0: i32) -> (i32, i32) {
    %c0_i32 = arith.constant 0 : i32
    %c0_i32_0 = arith.constant 0 : i32
    %c0_i32_1 = arith.constant 0 : i32
    return %c0_i32, %c0_i32_0 : i32, i32
  }
  func.func @transform_4(%arg0: i32) -> (i32, i32) {
    %c0_i32 = arith.constant 0 : i32
    %c0_i32_0 = arith.constant 0 : i32
    %c0_i32_1 = arith.constant 0 : i32
    return %c0_i32, %c0_i32_0 : i32, i32
  }
  func.func @transform_5(%arg0: i32) -> (i32, i32) {
    %c0_i32 = arith.constant 0 : i32
    %c0_i32_0 = arith.constant 0 : i32
    %c0_i32_1 = arith.constant 0 : i32
    return %c0_i32, %c0_i32_0 : i32, i32
  }
  func.func @transform_6(%arg0: i32) -> (i32, i32) {
    %c0_i32 = arith.constant 0 : i32
    %c0_i32_0 = arith.constant 0 : i32
    %c0_i32_1 = arith.constant 0 : i32
    return %c0_i32, %c0_i32_0 : i32, i32
  }
  func.func @transform_7(%arg0: i32) -> (i32, i32) {
    %c0_i32 = arith.constant 0 : i32
    %c0_i32_0 = arith.constant 0 : i32
    %c0_i32_1 = arith.constant 0 : i32
    return %c0_i32, %c0_i32_0 : i32, i32
  }
  func.func @transform_8(%arg0: i32) -> (i32, i32) {
    %c0_i32 = arith.constant 0 : i32
    %c0_i32_0 = arith.constant 0 : i32
    %c0_i32_1 = arith.constant 0 : i32
    return %c0_i32, %c0_i32_0 : i32, i32
  }
  func.func @transform_9(%arg0: i32) -> (i32, i32) {
    %c0_i32 = arith.constant 0 : i32
    %c0_i32_0 = arith.constant 0 : i32
    %c0_i32_1 = arith.constant 0 : i32
    return %c0_i32, %c0_i32_0 : i32, i32
  }
  func.func @transform_10(%arg0: i32) -> (i32, i32) {
    %c0_i32 = arith.constant 0 : i32
    %c0_i32_0 = arith.constant 0 : i32
    %c0_i32_1 = arith.constant 0 : i32
    return %c0_i32, %c0_i32_0 : i32, i32
  }
  func.func @transform_11(%arg0: i32) -> (i32, i32) {
    %c0_i32 = arith.constant 0 : i32
    %c0_i32_0 = arith.constant 0 : i32
    return %c0_i32, %arg0 : i32, i32
  }
}

module attributes {stable_mosaic.version = 11 : i64} {
  func.func @dressed_qnet_kernel(%arg0: i32, %arg1: memref<8x128xf32, #tpu.memory_space<vmem>>, %arg2: memref<8x8xf32, #tpu.memory_space<vmem>>, %arg3: memref<8x1xf32, #tpu.memory_space<vmem>>, %arg4: memref<8x1xf32, #tpu.memory_space<vmem>>, %arg5: memref<8x8xf32, #tpu.memory_space<vmem>>, %arg6: memref<8x8xf32, #tpu.memory_space<vmem>>, %arg7: memref<16x8xf32, #tpu.memory_space<vmem>>, %arg8: memref<16x8xf32, #tpu.memory_space<vmem>>, %arg9: memref<16x16xf32, #tpu.memory_space<vmem>>, %arg10: memref<5x16xf32, #tpu.memory_space<vmem>>, %arg11: memref<5x1xf32, #tpu.memory_space<vmem>>, %arg12: memref<5x128xf32, #tpu.memory_space<vmem>>) attributes {dimension_semantics = [#tpu.dimension_semantics<parallel>], iteration_bounds = array<i64: 1>, scalar_prefetch = 0 : i64, scratch_operands = 0 : i64, tpu.core_type = #tpu.core_type<tc>, window_params = [{transform_indices = @transform_0, window_bounds = array<i64: 8, 128>}, {pipeline_mode = #tpu.pipeline_mode<synchronous>, transform_indices = @transform_1, window_bounds = array<i64: 8, 8>}, {pipeline_mode = #tpu.pipeline_mode<synchronous>, transform_indices = @transform_2, window_bounds = array<i64: 8, 1>}, {pipeline_mode = #tpu.pipeline_mode<synchronous>, transform_indices = @transform_3, window_bounds = array<i64: 8, 1>}, {pipeline_mode = #tpu.pipeline_mode<synchronous>, transform_indices = @transform_4, window_bounds = array<i64: 8, 8>}, {pipeline_mode = #tpu.pipeline_mode<synchronous>, transform_indices = @transform_5, window_bounds = array<i64: 8, 8>}, {pipeline_mode = #tpu.pipeline_mode<synchronous>, transform_indices = @transform_6, window_bounds = array<i64: 16, 8>}, {pipeline_mode = #tpu.pipeline_mode<synchronous>, transform_indices = @transform_7, window_bounds = array<i64: 16, 8>}, {pipeline_mode = #tpu.pipeline_mode<synchronous>, transform_indices = @transform_8, window_bounds = array<i64: 16, 16>}, {pipeline_mode = #tpu.pipeline_mode<synchronous>, transform_indices = @transform_9, window_bounds = array<i64: 5, 16>}, {pipeline_mode = #tpu.pipeline_mode<synchronous>, transform_indices = @transform_10, window_bounds = array<i64: 5, 1>}, {transform_indices = @transform_11, window_bounds = array<i64: 5, 128>}]} {
    %c0 = arith.constant 0 : index
    %c0_0 = arith.constant 0 : index
    %0 = vector.load %arg2[%c0, %c0_0] : memref<8x8xf32, #tpu.memory_space<vmem>>, vector<8x8xf32>
    %c0_1 = arith.constant 0 : index
    %c0_2 = arith.constant 0 : index
    %1 = vector.load %arg1[%c0_1, %c0_2] : memref<8x128xf32, #tpu.memory_space<vmem>>, vector<8x128xf32>
    %cst = arith.constant dense<0.000000e+00> : vector<8x128xf32>
    %2 = tpu.matmul %0, %1, %cst {dimension_numbers = #tpu.dot_dimension_numbers<[1], [0], [0], [1], [0, 0, 1, 1], [], []>} : vector<8x8xf32>, vector<8x128xf32>, vector<8x128xf32> -> vector<8x128xf32>
    %c0_3 = arith.constant 0 : index
    %c0_4 = arith.constant 0 : index
    %3 = vector.load %arg3[%c0_3, %c0_4] : memref<8x1xf32, #tpu.memory_space<vmem>>, vector<8x1xf32>
    %4 = vector.broadcast %3 : vector<8x1xf32> to vector<8x128xf32>
    %5 = arith.addf %2, %4 : vector<8x128xf32>
    %6 = math.tanh %5 : vector<8x128xf32>
    %cst_5 = arith.constant 0.785398185 : f32
    %7 = vector.broadcast %cst_5 : f32 to vector<8x128xf32>
    %8 = arith.mulf %6, %7 : vector<8x128xf32>
    %c0_6 = arith.constant 0 : index
    %c0_7 = arith.constant 0 : index
    %9 = vector.load %arg4[%c0_6, %c0_7] : memref<8x1xf32, #tpu.memory_space<vmem>>, vector<8x1xf32>
    %10 = vector.broadcast %9 : vector<8x1xf32> to vector<8x128xf32>
    %11 = arith.addf %8, %10 : vector<8x128xf32>
    %12 = math.cos %11 : vector<8x128xf32>
    %c0_8 = arith.constant 0 : index
    %c0_9 = arith.constant 0 : index
    %13 = vector.load %arg5[%c0_8, %c0_9] : memref<8x8xf32, #tpu.memory_space<vmem>>, vector<8x8xf32>
    %cst_10 = arith.constant dense<0.000000e+00> : vector<8x128xf32>
    %14 = tpu.matmul %13, %12, %cst_10 {dimension_numbers = #tpu.dot_dimension_numbers<[1], [0], [0], [1], [0, 0, 1, 1], [], []>} : vector<8x8xf32>, vector<8x128xf32>, vector<8x128xf32> -> vector<8x128xf32>
    %c0_11 = arith.constant 0 : index
    %c0_12 = arith.constant 0 : index
    %15 = vector.load %arg6[%c0_11, %c0_12] : memref<8x8xf32, #tpu.memory_space<vmem>>, vector<8x8xf32>
    %cst_13 = arith.constant dense<0.000000e+00> : vector<8x128xf32>
    %16 = tpu.matmul %15, %12, %cst_13 {dimension_numbers = #tpu.dot_dimension_numbers<[1], [0], [0], [1], [0, 0, 1, 1], [], []>} : vector<8x8xf32>, vector<8x128xf32>, vector<8x128xf32> -> vector<8x128xf32>
    %17 = arith.mulf %14, %16 : vector<8x128xf32>
    %c0_14 = arith.constant 0 : index
    %c0_15 = arith.constant 0 : index
    %18 = vector.load %arg7[%c0_14, %c0_15] : memref<16x8xf32, #tpu.memory_space<vmem>>, vector<16x8xf32>
    %cst_16 = arith.constant dense<0.000000e+00> : vector<16x128xf32>
    %19 = tpu.matmul %18, %17, %cst_16 {dimension_numbers = #tpu.dot_dimension_numbers<[1], [0], [0], [1], [0, 0, 1, 1], [], []>} : vector<16x8xf32>, vector<8x128xf32>, vector<16x128xf32> -> vector<16x128xf32>
    %c0_17 = arith.constant 0 : index
    %c0_18 = arith.constant 0 : index
    %20 = vector.load %arg8[%c0_17, %c0_18] : memref<16x8xf32, #tpu.memory_space<vmem>>, vector<16x8xf32>
    %cst_19 = arith.constant dense<0.000000e+00> : vector<16x128xf32>
    %21 = tpu.matmul %20, %17, %cst_19 {dimension_numbers = #tpu.dot_dimension_numbers<[1], [0], [0], [1], [0, 0, 1, 1], [], []>} : vector<16x8xf32>, vector<8x128xf32>, vector<16x128xf32> -> vector<16x128xf32>
    %22 = arith.mulf %19, %21 : vector<16x128xf32>
    %c0_20 = arith.constant 0 : index
    %c0_21 = arith.constant 0 : index
    %23 = vector.load %arg9[%c0_20, %c0_21] : memref<16x16xf32, #tpu.memory_space<vmem>>, vector<16x16xf32>
    %cst_22 = arith.constant dense<0.000000e+00> : vector<16x128xf32>
    %24 = tpu.matmul %23, %22, %cst_22 {dimension_numbers = #tpu.dot_dimension_numbers<[1], [0], [0], [1], [0, 0, 1, 1], [], []>} : vector<16x16xf32>, vector<16x128xf32>, vector<16x128xf32> -> vector<16x128xf32>
    %25 = arith.mulf %24, %24 : vector<16x128xf32>
    %c0_23 = arith.constant 0 : index
    %c0_24 = arith.constant 0 : index
    %26 = vector.load %arg10[%c0_23, %c0_24] : memref<5x16xf32, #tpu.memory_space<vmem>>, vector<5x16xf32>
    %cst_25 = arith.constant dense<0.000000e+00> : vector<5x128xf32>
    %27 = tpu.matmul %26, %25, %cst_25 {dimension_numbers = #tpu.dot_dimension_numbers<[1], [0], [0], [1], [0, 0, 1, 1], [], []>} : vector<5x16xf32>, vector<16x128xf32>, vector<5x128xf32> -> vector<5x128xf32>
    %c0_26 = arith.constant 0 : index
    %c0_27 = arith.constant 0 : index
    %28 = vector.load %arg11[%c0_26, %c0_27] : memref<5x1xf32, #tpu.memory_space<vmem>>, vector<5x1xf32>
    %29 = vector.broadcast %28 : vector<5x1xf32> to vector<5x128xf32>
    %30 = arith.addf %27, %29 : vector<5x128xf32>
    %c0_28 = arith.constant 0 : index
    %c0_29 = arith.constant 0 : index
    %31 = vector.load %arg12[%c0_28, %c0_29] : memref<5x128xf32, #tpu.memory_space<vmem>>, vector<5x128xf32>
    tpu.vector_store %arg12[%c0_28, %c0_29], %30 {strides = array<i32>} : memref<5x128xf32, #tpu.memory_space<vmem>>, vector<5x128xf32>,
    return
  }
  func.func @transform_0(%arg0: i32) -> (i32, i32) {
    %c0_i32 = arith.constant 0 : i32
    %c0_i32_0 = arith.constant 0 : i32
    return %c0_i32, %arg0 : i32, i32
  }
  func.func @transform_1(%arg0: i32) -> (i32, i32) {
    %c0_i32 = arith.constant 0 : i32
    %c0_i32_0 = arith.constant 0 : i32
    %c0_i32_1 = arith.constant 0 : i32
    return %c0_i32, %c0_i32_0 : i32, i32
  }
  func.func @transform_2(%arg0: i32) -> (i32, i32) {
    %c0_i32 = arith.constant 0 : i32
    %c0_i32_0 = arith.constant 0 : i32
    %c0_i32_1 = arith.constant 0 : i32
    return %c0_i32, %c0_i32_0 : i32, i32
  }
  func.func @transform_3(%arg0: i32) -> (i32, i32) {
    %c0_i32 = arith.constant 0 : i32
    %c0_i32_0 = arith.constant 0 : i32
    %c0_i32_1 = arith.constant 0 : i32
    return %c0_i32, %c0_i32_0 : i32, i32
  }
  func.func @transform_4(%arg0: i32) -> (i32, i32) {
    %c0_i32 = arith.constant 0 : i32
    %c0_i32_0 = arith.constant 0 : i32
    %c0_i32_1 = arith.constant 0 : i32
    return %c0_i32, %c0_i32_0 : i32, i32
  }
  func.func @transform_5(%arg0: i32) -> (i32, i32) {
    %c0_i32 = arith.constant 0 : i32
    %c0_i32_0 = arith.constant 0 : i32
    %c0_i32_1 = arith.constant 0 : i32
    return %c0_i32, %c0_i32_0 : i32, i32
  }
  func.func @transform_6(%arg0: i32) -> (i32, i32) {
    %c0_i32 = arith.constant 0 : i32
    %c0_i32_0 = arith.constant 0 : i32
    %c0_i32_1 = arith.constant 0 : i32
    return %c0_i32, %c0_i32_0 : i32, i32
  }
  func.func @transform_7(%arg0: i32) -> (i32, i32) {
    %c0_i32 = arith.constant 0 : i32
    %c0_i32_0 = arith.constant 0 : i32
    %c0_i32_1 = arith.constant 0 : i32
    return %c0_i32, %c0_i32_0 : i32, i32
  }
  func.func @transform_8(%arg0: i32) -> (i32, i32) {
    %c0_i32 = arith.constant 0 : i32
    %c0_i32_0 = arith.constant 0 : i32
    %c0_i32_1 = arith.constant 0 : i32
    return %c0_i32, %c0_i32_0 : i32, i32
  }
  func.func @transform_9(%arg0: i32) -> (i32, i32) {
    %c0_i32 = arith.constant 0 : i32
    %c0_i32_0 = arith.constant 0 : i32
    %c0_i32_1 = arith.constant 0 : i32
    return %c0_i32, %c0_i32_0 : i32, i32
  }
  func.func @transform_10(%arg0: i32) -> (i32, i32) {
    %c0_i32 = arith.constant 0 : i32
    %c0_i32_0 = arith.constant 0 : i32
    %c0_i32_1 = arith.constant 0 : i32
    return %c0_i32, %c0_i32_0 : i32, i32
  }
  func.func @transform_11(%arg0: i32) -> (i32, i32) {
    %c0_i32 = arith.constant 0 : i32
    %c0_i32_0 = arith.constant 0 : i32
    return %c0_i32, %arg0 : i32, i32
  }
}

</mosaic_0001>

<bundles_post_ra>
// kernel: tpu_custom_call.1
= control target key start
LH: loop header
LB: loop body
LE: loop exit
PB: predicated region body
PF: predicated region fallthrough
CT: control target
= control target key end

     0   :  { %vm62_vm0 = vcmask 64512   ;;  %v1013_v2 = vmov 0.0|0.0   ;;  %vm1014_vm2 = vmmov 0   ;;  %v1015_v5 = vmov 0.0   ;;  %s1255_s0 = inlined_call_operand.vmem [shape: f32[128,8], index: 0, kind: input, shape index: {}]   ;;  %s1256_s1 = inlined_call_operand.vmem [shape: f32[8,8], index: 1, kind: input, shape index: {}]   ;;  %s1257_s2 = inlined_call_operand.vmem [shape: f32[8,1], index: 2, kind: input, shape index: {}]   ;;  %s1258_s3 = inlined_call_operand.vmem [shape: f32[8,1], index: 3, kind: input, shape index: {}]   ;;  %s1259_s4 = inlined_call_operand.vmem [shape: f32[8,8], index: 4, kind: input, shape index: {}]   ;;  %s1260_s5 = inlined_call_operand.vmem [shape: f32[8,8], index: 5, kind: input, shape index: {}]   ;;  %s1261_s6 = inlined_call_operand.vmem [shape: f32[16,8], index: 6, kind: input, shape index: {}]   ;;  %s1262_s7 = inlined_call_operand.vmem [shape: f32[16,8], index: 7, kind: input, shape index: {}]   ;;  %s1263_s8 = inlined_call_operand.vmem [shape: f32[16,16], index: 8, kind: input, shape index: {}]   ;;  %s1264_s9 = inlined_call_operand.vmem [shape: f32[5,16], index: 9, kind: input, shape index: {}]   ;;  %s1265_s10 = inlined_call_operand.vmem [shape: f32[5,1], index: 10, kind: input, shape index: {}]   ;;  %s1266_s11 = inlined_call_operand.hbm [shape: f32[5,128], index: 11, kind: output, shape index: {}]  }
   0x1   :  { %v40_v0 = vld [vmem:[%s1255_s0] sm:$0xff]  ;;  %v41_v1 = vld [vmem:[%s1255_s0 + $0x8] sm:$0xff]  ;;  %927 = vmatprep.subr.bf16.mxu0 %v1013_v2  ;;  %vm1093_vm1 = vmpackc.low %vm62_vm0, %vm62_vm0  ;;  %890 = vmatprep.mubr.msk.f32.mxu0 %vm1014_vm2, %v1015_v5  ;;  %v1016_v6 = vmov 0  }
   0x2   :  { %v928_v3 = vpack.c.bf16 %v41_v1, %v40_v0  ;;  %981 = vset.pattern.permute.xlu0 %v1016_v6  ;;  %893 = vmatprep.subr.mxu1 %v1015_v5  ;;  %v42_v7 = vld [vmem:[%s1255_s0 + $0x10] sm:$0xff]  ;;  %v43_v8 = vld [vmem:[%s1255_s0 + $0x18] sm:$0xff]  ;;  %v56_v9 = vld [vmem:[%s1257_s2] sm:$0xff] }
   0x3   :  { %895 = vmatprep.mubr.msk.f32.mxu1 %vm1014_vm2, %v1015_v5  ;;  %982 = vset.pattern.permute.xlu1 %v1016_v6 }
   0x4   :  { %930 = vmatpush3.bf16.xpose.msk.msra.mxu0 %vm1093_vm1, %v928_v3 }
   0x5   :  { %931 = vmatprep.subr.bf16.mxu0 %v1013_v2 }
   0x6   :  { %16 = vsyncpa [#allocation3], 0  ;;  %v932_v10 = vpack.c.bf16 %v43_v8, %v42_v7  ;;  %59 = vperm.xlu0 %981, %v56_v9   ;;  %v186_v11 = vld [vmem:[%s1258_s3] sm:$0xff]  ;;  %v45_v13 = vld [vmem:[%s1255_s0 + $0x28] sm:$0xff]  ;;  %v1017_v49 = vmov 683565275  }
   0x7   :  { %v44_v12 = vld [vmem:[%s1255_s0 + $0x20] sm:$0xff]  ;;  %v46_v15 = vld [vmem:[%s1255_s0 + $0x30] sm:$0xff]  ;;  %v47_v16 = vld [vmem:[%s1255_s0 + $0x38] sm:$0xff]  ;;  %v1018_v51 = vmov 2475754826   ;;  %s1023_s26 = smov [#allocation2]  }
   0x8   :  { %v936_v14 = vpack.c.bf16 %v45_v13, %v44_v12  ;;  %v940_v17 = vpack.c.bf16 %v47_v16, %v46_v15  ;;  %v48_v18 = vld [vmem:[%s1255_s0 + $0x40] sm:$0xff]  ;;  %v49_v19 = vld [vmem:[%s1255_s0 + $0x48] sm:$0xff]  ;;  %v50_v21 = vld [vmem:[%s1255_s0 + $0x50] sm:$0xff]  ;;  %v1019_v54 = vmov 2131351028   ;;  %s786_s27 = sshll.u32 %s1023_s26, 4  ;;  %s787_s27 = int_to_ptr.vmem [resolvable:$true] %s786_s27 }
   0x9   :  { %v944_v20 = vpack.c.bf16 %v49_v19, %v48_v18  ;;  %v51_v22 = vld [vmem:[%s1255_s0 + $0x58] sm:$0xff]  ;;  %v52_v24 = vld [vmem:[%s1255_s0 + $0x60] sm:$0xff]  ;;  %v53_v25 = vld [vmem:[%s1255_s0 + $0x68] sm:$0xff]  ;;  %v1020_v57 = vmov 2102212464   ;;  %p994_p1 = scmp.lt.s32.totalorder %s787_s27, %s787_s27 }
   0xa   :  { %189 = vperm.xlu0 %981, %v186_v11   ;;  %v948_v23 = vpack.c.bf16 %v51_v22, %v50_v21  ;;  %v952_v26 = vpack.c.bf16 %v53_v25, %v52_v24  ;;  %v54_v27 = vld [vmem:[%s1255_s0 + $0x70] sm:$0xff]  ;;  %v55_v28 = vld [vmem:[%s1255_s0 + $0x78] sm:$0xff]  ;;  %v39_v30 = vld [vmem:[%s1256_s1] sm:$0xff]  ;;  %v1021_v60 = vmov 920167782  }
   0xb   :  { %v956_v29 = vpack.c.bf16 %v55_v28, %v54_v27  ;;  %v1022_v63 = vmov 1326507024  }
   0xc   :  { %934 = vmatpush3.bf16.xpose.msk.msra.mxu0 %vm1093_vm1, %v932_v10 }
   0xd   :  { %935 = vmatprep.subr.bf16.mxu0 %v1013_v2 }
  0x14   :  { %938 = vmatpush3.bf16.xpose.msk.msra.mxu0 %vm1093_vm1, %v936_v14 }
  0x15   :  { %939 = vmatprep.subr.bf16.mxu0 %v1013_v2 }
  0x1c   :  { %942 = vmatpush3.bf16.xpose.msk.msra.mxu0 %vm1093_vm1, %v940_v17 }
  0x1d   :  { %943 = vmatprep.subr.bf16.mxu0 %v1013_v2 }
  0x24   :  { %946 = vmatpush3.bf16.xpose.msk.msra.mxu0 %vm1093_vm1, %v944_v20 }
  0x25   :  { %947 = vmatprep.subr.bf16.mxu0 %v1013_v2 }
  0x2c   :  { %950 = vmatpush3.bf16.xpose.msk.msra.mxu0 %vm1093_vm1, %v948_v23 }
  0x2d   :  { %951 = vmatprep.subr.bf16.mxu0 %v1013_v2 }
  0x34   :  { %954 = vmatpush3.bf16.xpose.msk.msra.mxu0 %vm1093_vm1, %v952_v26 }
  0x35   :  { %955 = vmatprep.subr.bf16.mxu0 %v1013_v2 }
  0x3c   :  { %958 = vmatpush3.bf16.xpose.msk.msra.mxu0 %vm1093_vm1, %v956_v29  ;;  %vm615_vm1 = vcmask 130048  }
  0x43   :  { %891 = vmatmul.mubr.msk.f32.vlgmr.msra.gmra.mrb[0].mxu0 %vm62_vm0, %v39_v30 }
  0x85   :  { %v60_v31 = vpop.permute.xlu0 %59 }
  0x89   :  { %v190_v37 = vpop.permute.xlu0 %189 }
 0x116   :  { %v180_v32 = vpop.f32.mrb[0].mxu0 }
 0x117   :  { %v181_v33 = vadd.f32 %v180_v32, %v60_v31  ;;  %v892_v34 = vpop.f32.mrb[1].mxu0 }
 0x119   :  { %983 = vtanh.f32 %v181_v33 }
 0x123   :  { %v984_v35 = vpop.eup %983 }
 0x124   :  { %v185_v36 = vmul.f32 0.7853982, %v984_v35 }
 0x126   :  { %v1177_v38 = vadd.f32 %v190_v37, %v185_v36 }
 0x128   :  { %v196_v39 = vand.u32 2139095040, %v1177_v38  ;;  %v193_v43 = vand.u32 2147483647, %v1177_v38  ;;  %vm195_vm10 = vcmp.lt.s32.totalorder %v1177_v38, 0  ;;  %vm285_vm15 = vweird.f32 %v1177_v38 }
 0x12a   :  { %v197_v40 = vshrl.u32 %v196_v39, 23  ;;  %v200_v47 = vand.u32 8388607, %v193_v43  ;;  %vm194_vm11 = vcmp.le.f32.partialorder %v193_v43, 0.7853982 }
 0x12c   :  { %v811_v41 = vadd.s32 4294967169, %v197_v40  ;;  %v201_v1 = vor.u32 8388608, %v200_v47 }
 0x12e   :  { %v203_v42 = vadd.s32 1, %v811_v41  ;;  %v241_v17 = vshll.u32 %v201_v1, 8 }
 0x130   :  { %vm204_vm3 = vcmp.gt.s32.totalorder %v203_v42, 0 }
 0x131   :  { %v205_v44 = vsel %vm204_vm3, %v203_v42, 0 }
 0x132   :  { %v207_v45 = vand.u32 31, %v205_v44  ;;  %v206_v48 = vshrl.u32 %v205_v44, 5 }
 0x134   :  { %v208_v46 = vsub.s32 32, %v207_v45  ;;  %v210_v50 = vshll.u32 %v1017_v49, %v207_v45  ;;  %v213_v52 = vshll.u32 %v1018_v51, %v207_v45  ;;  %v216_v56 = vshll.u32 %v1019_v54, %v207_v45 }
 0x135   :  { %v219_v59 = vshll.u32 %v1020_v57, %v207_v45  ;;  %v222_v62 = vshll.u32 %v1021_v60, %v207_v45  ;;  %vm225_vm4 = vcmp.lt.s32.totalorder %v206_v48, 1  ;;  %vm228_vm5 = vcmp.lt.s32.totalorder %v206_v48, 4 }
 0x136   :  { %v211_v53 = vshrl.u32 %v1018_v51, %v208_v46  ;;  %v214_v55 = vshrl.u32 %v1019_v54, %v208_v46  ;;  %v217_v58 = vshrl.u32 %v1020_v57, %v208_v46  ;;  %v220_v61 = vshrl.u32 %v1021_v60, %v208_v46 }
 0x137   :  { %v223_v0 = vshrl.u32 %v1022_v63, %v208_v46  ;;  %v209_v12 = vshrl.u32 %v1017_v49, %v208_v46  ;;  %vm227_vm6 = vcmp.lt.s32.totalorder %v206_v48, 3  ;;  %vm226_vm7 = vcmp.lt.s32.totalorder %v206_v48, 2 }
 0x138   :  { %v212_v3 = vor.u32 %v211_v53, %v210_v50  ;;  %v215_v4 = vor.u32 %v214_v55, %v213_v52  ;;  %v218_v6 = vor.u32 %v217_v58, %v216_v56  ;;  %v221_v7 = vor.u32 %v220_v61, %v219_v59 }
 0x139   :  { %v224_v8 = vor.u32 %v223_v0, %v222_v62 }
 0x13a   :  { %v230_v9 = vsel %vm228_vm5, %v218_v6, 2102212464  ;;  %v233_v10 = vsel %vm225_vm4, %v212_v3, %v215_v4  ;;  %v237_v11 = vsel %vm225_vm4, %v215_v4, %v218_v6  ;;  %v234_v13 = vsel %vm228_vm5, %v221_v7, 920167782 }
 0x13b   :  { %v238_v14 = vsel %vm228_vm5, %v224_v8, 1326507024  ;;  %v235_v15 = vsel %vm227_vm6, %v218_v6, %v234_v13  ;;  %v229_v18 = vsel %vm225_vm4, %v209_v12, %v212_v3  ;;  %v231_v19 = vsel %vm227_vm6, %v215_v4, %v230_v9  ;;  %v296_v4 = vld [vmem:[%s1259_s4] sm:$0xff]  ;;  %v446_v13 = vld [vmem:[%s1261_s6 + $0x8] sm:$0xff] }
 0x13c   :  { %v239_v16 = vsel %vm227_vm6, %v221_v7, %v238_v14  ;;  %v236_v20 = vsel %vm226_vm7, %v233_v10, %v235_v15  ;;  %v232_v26 = vsel %vm226_vm7, %v229_v18, %v231_v19  ;;  %v370_v7 = vld [vmem:[%s1260_s5] sm:$0xff]  ;;  %v529_v15 = vld [vmem:[%s1262_s7 + $0x8] sm:$0xff] }
 0x13d   :  { %v240_v21 = vsel %vm226_vm7, %v237_v11, %v239_v16  ;;  %v1186_v24 = vmul.u32.u64.low %v241_v17, %v236_v20  ;;  %v1187_v25 = vmul.u32.u64.high %v241_v17, %v236_v20, %v1186_v24  ;;  %v248_v28 = vmul.u32 %v241_v17, %v232_v26  ;;  %v528_v14 = vld [vmem:[%s1262_s7] sm:$0xff] }
 0x13e   :  { %v1183_v22 = vmul.u32.u64.low %v241_v17, %v240_v21  ;;  %v1184_v23 = vmul.u32.u64.high %v241_v17, %v240_v21, %v1183_v22  ;;  %v613_v16 = vld [vmem:[%s1263_s8] sm:$0xff] }
 0x13f   :  { %v251_v27 = vadd.s32 1, %v1187_v25 }
 0x140   :  { %vm250_vm8 = vc.u32 %v1184_v23, %v1186_v24  ;;  %v249_v41 = vadd.s32 %v1186_v24, %v1184_v23  ;;  %v614_v24 = vld [vmem:[%s1263_s8 + $0x8] sm:$0xff] }
 0x141   :  { %v252_v29 = vsel %vm250_vm8, %v251_v27, %v1187_v25  ;;  %v700_v25 = vld [vmem:[%s1265_s10] sm:$0x1f]  ;;  %s989_s10 = scalar_lea.vmem %s787_s27, 128 }
 0x142   :  { %v253_v30 = vadd.s32 %v252_v29, %v248_v28  ;;  %703 = vperm.xlu1 %982, %v700_v25   ;;  %p990_p0 = scmp.ne.s32.totalorder %s787_s27, %s989_s10  ;;  %p995_p2 = scmp.lt.s32.totalorder %s989_s10, %s989_s10 }
 0x144   :  { %v254_v31 = vadd.s32 536870912, %v253_v30  ;;  %p996_p3 = por %p995_p2, %p994_p1 }
 0x146   :  { %v255_v32 = vshrl.u32 %v254_v31, 30  ;;  %p997_p4 = pnand %p996_p3, %p990_p0 }
 0x148   :  { %v256_v33 = vshll.u32 %v255_v32, 30  ;;  %v279_v56 = vsub.s32 4, %v255_v32 }
 0x14a   :  { %v257_v34 = vsub.s32 %v253_v30, %v256_v33  ;;  %v280_v58 = vsel %vm195_vm10, %v279_v56, %v255_v32 }
 0x14b   :  { %v282_v59 = vsel %vm194_vm11, 0, %v280_v58 }
 0x14c   :  { %v259_v35 = vsub.s32 0, %v257_v34  ;;  %v286_v60 = vand.u32 3, %v282_v59 }
 0x14e   :  { %v812_v36 = vmin.u32 %v259_v35, %v257_v34  ;;  %vm291_vm12 = vcmp.eq.s32.totalorder %v286_v60, 2  ;;  %vm288_vm13 = vcmp.eq.s32.totalorder %v286_v60, 0  ;;  %vm287_vm14 = vcmp.lt.s32.totalorder %v286_v60, 2 }
 0x150   :  { %v261_v37 = vclz %v812_v36 }
 0x152   :  { %v813_v39 = vadd.s32 4294967294, %v261_v37 }
 0x154   :  { %vm814_vm9 = vcmp.lt.s32.totalorder %v813_v39, 0 }
 0x155   :  { %v264_v40 = vsel %vm814_vm9, 0, %v813_v39 }
 0x156   :  { %v265_v42 = vsub.s32 32, %v264_v40  ;;  %v269_v44 = vsub.s32 4294967266, %v264_v40  ;;  %v266_v45 = vshll.u32 %v257_v34, %v264_v40 }
 0x158   :  { %v267_v46 = vshrl.u32 %v249_v41, %v265_v42  ;;  %v270_v47 = vadd.s32 127, %v269_v44 }
 0x15a   :  { %v268_v48 = vor.u32 %v267_v46, %v266_v45  ;;  %v271_v49 = vshll.u32 %v270_v47, 23 }
 0x15c   :  { %v272_v50 = vor.u32 4788187, %v271_v49  ;;  %v275_v52 = vcvt.s32.f32 %v268_v48 }
 0x15e   :  { %v273_v51 = vand.u32 2147483647, %v272_v50 }
 0x160   :  { %v276_v53 = vmul.f32 %v275_v52, %v273_v51 }
 0x162   :  { %v277_v54 = vxor.u32 2147483648, %v276_v53 }
 0x164   :  { %v278_v55 = vsel %vm195_vm10, %v277_v54, %v276_v53 }
 0x165   :  { %v281_v57 = vsel %vm194_vm11, %v1177_v38, %v278_v55  ;;  %v445_v38 = vld [vmem:[%s1261_s6] sm:$0xff] }
 0x166   :  { %985 = vcosq.f32 %v281_v57 }
 0x167   :  { %987 = vsinq.f32 %v281_v57 }
 0x170   :  { %v986_v61 = vpop.eup %985 }
 0x171   :  { %v988_v62 = vpop.eup %987  ;;  %v292_v63 = vxor.u32 2147483648, %v986_v61 }
 0x172   :  { %v289_v0 = vxor.u32 2147483648, %v988_v62 }
 0x173   :  { %v293_v1 = vsel %vm291_vm12, %v292_v63, %v988_v62 }
 0x174   :  { %v290_v3 = vsel %vm288_vm13, %v986_v61, %v289_v0 }
 0x175   :  { %v294_v43 = vsel %vm287_vm14, %v290_v3, %v293_v1 }
 0x176   :  { %v295_v6 = vsel %vm285_vm15, nan, %v294_v43 }
 0x177   :  { %894 = vmatpush3.msra.mxu1 %v295_v6 }
 0x178   :  { %896 = vmatmul.mubr.msk.f32.vlgmr.msra.gmra.mrb[0].mxu1 %vm62_vm0, %v296_v4  ;;  %898 = vmatprep.subr.mxu1 %v1015_v5 }
 0x179   :  { %899 = vmatpush3.msra.mxu1 %v295_v6  ;;  %900 = vmatprep.mubr.msk.f32.mxu1 %vm1014_vm2, %v1015_v5 }
 0x17c   :  { %901 = vmatmul.mubr.msk.f32.vlgmr.msra.gmra.mrb[2].mxu1 %vm62_vm0, %v370_v7 }
 0x17d   :  { %905 = vmatprep.mubr.msk.f32.mxu1 %vm62_vm0, %v445_v38 }
 0x1c1   :  { %v704_v31 = vpop.permute.xlu1 %703 }
 0x24b   :  { %v366_v8 = vpop.f32.mrb[0].mxu1 }
 0x24c   :  { %v897_v9 = vpop.f32.mrb[1].mxu1 }
 0x24f   :  { %v440_v10 = vpop.f32.mrb[2].mxu1 }
 0x250   :  { %v444_v11 = vmul.f32 %v440_v10, %v366_v8  ;;  %v902_v12 = vpop.f32.mrb[3].mxu1 }
 0x252   :  { %903 = vmatprep.subr.mxu1 %v444_v11 }
 0x253   :  { %904 = vmatpush3.msra.mxu1 %v444_v11 }
 0x254   :  { %906 = vmatmul.mubr.msk.f32.vlgmr.msra.gmra.mrb[4].mxu1 %vm62_vm0, %v446_v13  ;;  %908 = vmatprep.subr.mxu1 %v444_v11 }
 0x255   :  { %909 = vmatpush3.msra.mxu1 %v444_v11  ;;  %910 = vmatprep.mubr.msk.f32.mxu1 %vm62_vm0, %v528_v14 }
 0x258   :  { %911 = vmatmul.mubr.msk.f32.vlgmr.msra.gmra.mrb[6].mxu1 %vm62_vm0, %v529_v15 }
 0x259   :  { %917 = vmatprep.mubr.msk.f32.mxu1 %vm615_vm1, %v613_v16 }
 0x327   :  { %v907_v17 = vpop.f32.mrb[4].mxu1 }
 0x328   :  { %v519_v18 = vpop.f32.mrb[5].mxu1 }
 0x32b   :  { %v912_v19 = vpop.f32.mrb[6].mxu1 }
 0x32c   :  { %v612_v20 = vmul.f32 %v912_v19, %v907_v17  ;;  %v602_v21 = vpop.f32.mrb[7].mxu1 }
 0x32d   :  { %v611_v22 = vmul.f32 %v602_v21, %v519_v18 }
 0x32f   :  { %v959_v23 = vpack.c.bf16 %v612_v20, %v611_v22 }
 0x331   :  { %960 = vmatprep.subr.bf16.mxu1 %v959_v23 }
 0x332   :  { %962 = vmatpush3.bf16.msra.mxu1 %v959_v23 }
 0x333   :  { %963 = vmatprep.subr.bf16.mxu1 %v1013_v2  ;;  %v699_v2 = vld [vmem:[%s1264_s9] sm:$0x1f] }
 0x335   :  { %918 = vmatmul.mubr.msk.f32.vlgmr.msra.gmra.mrb[8].mxu1 %vm615_vm1, %v614_v24 }
 0x336   :  { %924 = vmatprep.mubr.msk.f32.mxu1 %vm1014_vm2, %v1015_v5 }
 0x408   :  { %v919_v26 = vpop.f32.mrb[8].mxu1 }
 0x409   :  { %v698_v27 = vmul.f32 %v919_v26, %v919_v26  ;;  %v688_v28 = vpop.f32.mrb[9].mxu1 }
 0x40a   :  { %v697_v29 = vmul.f32 %v688_v28, %v688_v28 }
 0x40c   :  { %v964_v30 = vpack.c.bf16 %v698_v27, %v697_v29 }
 0x40e   :  { %965 = vmatpush3.bf16.msra.mxu1 %v964_v30 }
 0x411   :  { %925 = vmatmul.mubr.msk.f32.vlgmr.msra.gmra.mrb[10].mxu1 %vm615_vm1, %v699_v2 }
 0x4e4   :  { %v775_v5 = vpop.f32.mrb[10].mxu1 }
 0x4e5   :  { %v776_v32 = vadd.f32 %v775_v5, %v704_v31  ;;  %v926_v33 = vpop.f32.mrb[11].mxu1 }
 0x4e7   :  { %779 = vst [vmem:[#allocation2] sm:$0x1f] %v776_v32 }
 0x4e8   :  { %1000 = shalt.err (!%p997_p4)
}
 0x4e9   :  { %s1001_s9 = scalar_lea.hbm %s1266_s11, 128 }
 0x4ea   :  { %p1002_p5 = scmp.ne.s32.totalorder %s1266_s11, %s1001_s9  ;;  %p1005_p6 = scmp.lt.u32.totalorder %s1001_s9, %s1266_s11 }
 0x4ec   :  { %p1007_p7 = pnand %p1005_p6, %p1002_p5 }
 0x4ee   :  { %1010 = shalt.err (!%p1007_p7)
}
 0x4ef   :  { %789 = dma.vmem_to_hbm [thread:$0]  %s787_s27, 128, %s1266_s11, [#allocation3]  }
 0x4f0   :  { %1011 = dma.done.wait [#allocation3], 128  }
 0x4f1   :  { %1012 = vsyncadd [#allocation3], 4294967168 }
 0x4f2   :  { %793 = vsyncpa [#allocation3], 1 }

// kernel: tpu_custom_call.1
= control target key start
LH: loop header
LB: loop body
LE: loop exit
PB: predicated region body
PF: predicated region fallthrough
CT: control target
= control target key end

     0   :  { %vm47_vm0 = vcmask 64512   ;;  %v857_v2 = vmov 0.0   ;;  %vm858_vm1 = vmmov 0   ;;  %s1024_s0 = inlined_call_operand.vmem [shape: f32[8,128], index: 0, kind: input, shape index: {}]   ;;  %s1025_s1 = inlined_call_operand.vmem [shape: f32[8,8], index: 1, kind: input, shape index: {}]   ;;  %s1026_s2 = inlined_call_operand.vmem [shape: f32[8,1], index: 2, kind: input, shape index: {}]   ;;  %s1027_s3 = inlined_call_operand.vmem [shape: f32[8,1], index: 3, kind: input, shape index: {}]   ;;  %s1028_s4 = inlined_call_operand.vmem [shape: f32[8,8], index: 4, kind: input, shape index: {}]   ;;  %s1029_s5 = inlined_call_operand.vmem [shape: f32[8,8], index: 5, kind: input, shape index: {}]   ;;  %s1030_s6 = inlined_call_operand.vmem [shape: f32[16,8], index: 6, kind: input, shape index: {}]   ;;  %s1031_s7 = inlined_call_operand.vmem [shape: f32[16,8], index: 7, kind: input, shape index: {}]   ;;  %s1032_s8 = inlined_call_operand.vmem [shape: f32[16,16], index: 8, kind: input, shape index: {}]   ;;  %s1033_s9 = inlined_call_operand.vmem [shape: f32[5,16], index: 9, kind: input, shape index: {}]   ;;  %s1034_s10 = inlined_call_operand.vmem [shape: f32[5,1], index: 10, kind: input, shape index: {}]   ;;  %s1035_s11 = inlined_call_operand.hbm [shape: f32[5,128], index: 11, kind: output, shape index: {}]  }
   0x1   :  { %v40_v0 = vld [vmem:[%s1024_s0] sm:$0xff]  ;;  %764 = vmatprep.subr.mxu0 %v857_v2  ;;  %766 = vmatprep.mubr.msk.f32.mxu0 %vm858_vm1, %v857_v2 }
   0x2   :  { %v39_v1 = vld [vmem:[%s1025_s1] sm:$0xff] }
   0x3   :  { %v41_v3 = vld [vmem:[%s1026_s2] sm:$0xff] }
   0x4   :  { %16 = vsyncpa [#allocation3], 0  ;;  %765 = vmatpush3.msra.mxu0 %v40_v0  ;;  %v859_v4 = vmov 0   ;;  %v123_v5 = vld [vmem:[%s1027_s3] sm:$0xff]  ;;  %769 = vmatprep.subr.mxu1 %v857_v2  ;;  %v860_v24 = vmov 683565275  }
   0x5   :  { %825 = vset.pattern.permute.xlu0 %v859_v4  ;;  %767 = vmatmul.mubr.msk.f32.vlgmr.msra.gmra.mrb[0].mxu0 %vm47_vm0, %v39_v1  ;;  %v861_v26 = vmov 2475754826   ;;  %v862_v29 = vmov 2131351028   ;;  %v863_v32 = vmov 2102212464  }
   0x6   :  { %44 = vperm.xlu0 %825, %v41_v3   ;;  %774 = vmatprep.subr.mxu0 %v857_v2  ;;  %v864_v35 = vmov 920167782   ;;  %v865_v38 = vmov 1326507024   ;;  %vm552_vm15 = vcmask 130048  }
   0x7   :  { %771 = vmatprep.mubr.msk.f32.mxu1 %vm858_vm1, %v857_v2  ;;  %776 = vmatprep.mubr.msk.f32.mxu0 %vm858_vm1, %v857_v2 }
   0x8   :  { %826 = vset.pattern.permute.xlu1 %v859_v4 }
   0xa   :  { %126 = vperm.xlu0 %825, %v123_v5  }
  0x85   :  { %v45_v6 = vpop.permute.xlu0 %44 }
  0x89   :  { %v127_v12 = vpop.permute.xlu0 %126 }
  0xd8   :  { %v117_v7 = vpop.f32.mrb[0].mxu0 }
  0xd9   :  { %v118_v8 = vadd.f32 %v117_v7, %v45_v6  ;;  %v768_v9 = vpop.f32.mrb[1].mxu0 }
  0xdb   :  { %827 = vtanh.f32 %v118_v8 }
  0xe5   :  { %v828_v10 = vpop.eup %827 }
  0xe6   :  { %v122_v11 = vmul.f32 0.7853982, %v828_v10 }
  0xe8   :  { %v950_v13 = vadd.f32 %v127_v12, %v122_v11 }
  0xea   :  { %v133_v14 = vand.u32 2139095040, %v950_v13  ;;  %v130_v18 = vand.u32 2147483647, %v950_v13  ;;  %vm132_vm9 = vcmp.lt.s32.totalorder %v950_v13, 0  ;;  %vm222_vm14 = vweird.f32 %v950_v13 }
  0xec   :  { %v134_v15 = vshrl.u32 %v133_v14, 23  ;;  %v137_v22 = vand.u32 8388607, %v130_v18  ;;  %vm131_vm10 = vcmp.le.f32.partialorder %v130_v18, 0.7853982 }
  0xee   :  { %v732_v16 = vadd.s32 4294967169, %v134_v15  ;;  %v138_v40 = vor.u32 8388608, %v137_v22 }
  0xf0   :  { %v140_v17 = vadd.s32 1, %v732_v16  ;;  %v178_v54 = vshll.u32 %v138_v40, 8 }
  0xf2   :  { %vm141_vm2 = vcmp.gt.s32.totalorder %v140_v17, 0 }
  0xf3   :  { %v142_v19 = vsel %vm141_vm2, %v140_v17, 0 }
  0xf4   :  { %v144_v20 = vand.u32 31, %v142_v19  ;;  %v143_v23 = vshrl.u32 %v142_v19, 5 }
  0xf6   :  { %v145_v21 = vsub.s32 32, %v144_v20  ;;  %v147_v25 = vshll.u32 %v860_v24, %v144_v20  ;;  %v150_v27 = vshll.u32 %v861_v26, %v144_v20  ;;  %v153_v31 = vshll.u32 %v862_v29, %v144_v20 }
  0xf7   :  { %v156_v34 = vshll.u32 %v863_v32, %v144_v20  ;;  %v159_v37 = vshll.u32 %v864_v35, %v144_v20  ;;  %vm162_vm3 = vcmp.lt.s32.totalorder %v143_v23, 1  ;;  %vm165_vm4 = vcmp.lt.s32.totalorder %v143_v23, 4 }
  0xf8   :  { %v148_v28 = vshrl.u32 %v861_v26, %v145_v21  ;;  %v151_v30 = vshrl.u32 %v862_v29, %v145_v21  ;;  %v154_v33 = vshrl.u32 %v863_v32, %v145_v21  ;;  %v157_v36 = vshrl.u32 %v864_v35, %v145_v21 }
  0xf9   :  { %v160_v39 = vshrl.u32 %v865_v38, %v145_v21  ;;  %v146_v49 = vshrl.u32 %v860_v24, %v145_v21  ;;  %vm164_vm5 = vcmp.lt.s32.totalorder %v143_v23, 3  ;;  %vm163_vm6 = vcmp.lt.s32.totalorder %v143_v23, 2 }
  0xfa   :  { %v149_v41 = vor.u32 %v148_v28, %v147_v25  ;;  %v152_v42 = vor.u32 %v151_v30, %v150_v27  ;;  %v155_v43 = vor.u32 %v154_v33, %v153_v31  ;;  %v158_v44 = vor.u32 %v157_v36, %v156_v34 }
  0xfb   :  { %v161_v45 = vor.u32 %v160_v39, %v159_v37 }
  0xfc   :  { %v167_v46 = vsel %vm165_vm4, %v155_v43, 2102212464  ;;  %v170_v47 = vsel %vm162_vm3, %v149_v41, %v152_v42  ;;  %v174_v48 = vsel %vm162_vm3, %v152_v42, %v155_v43  ;;  %v171_v50 = vsel %vm165_vm4, %v158_v44, 920167782 }
  0xfd   :  { %v175_v51 = vsel %vm165_vm4, %v161_v45, 1326507024  ;;  %v172_v52 = vsel %vm164_vm5, %v155_v43, %v171_v50  ;;  %v166_v55 = vsel %vm162_vm3, %v146_v49, %v149_v41  ;;  %v168_v56 = vsel %vm164_vm5, %v152_v42, %v167_v46  ;;  %v233_v41 = vld [vmem:[%s1028_s4] sm:$0xff]  ;;  %v383_v50 = vld [vmem:[%s1030_s6 + $0x8] sm:$0xff] }
  0xfe   :  { %v176_v53 = vsel %vm164_vm5, %v158_v44, %v175_v51  ;;  %v173_v57 = vsel %vm163_vm6, %v170_v47, %v172_v52  ;;  %v169_v63 = vsel %vm163_vm6, %v166_v55, %v168_v56  ;;  %v307_v42 = vld [vmem:[%s1029_s5] sm:$0xff]  ;;  %v466_v51 = vld [vmem:[%s1031_s7 + $0x8] sm:$0xff] }
  0xff   :  { %v177_v58 = vsel %vm163_vm6, %v174_v48, %v176_v53  ;;  %v959_v61 = vmul.u32.u64.low %v178_v54, %v173_v57  ;;  %v960_v62 = vmul.u32.u64.high %v178_v54, %v173_v57, %v959_v61  ;;  %v185_v1 = vmul.u32 %v178_v54, %v169_v63  ;;  %v465_v44 = vld [vmem:[%s1031_s7] sm:$0xff] }
 0x100   :  { %v956_v59 = vmul.u32.u64.low %v178_v54, %v177_v58  ;;  %v957_v60 = vmul.u32.u64.high %v178_v54, %v177_v58, %v956_v59  ;;  %v550_v52 = vld [vmem:[%s1032_s8] sm:$0xff] }
 0x101   :  { %v188_v0 = vadd.s32 1, %v960_v62 }
 0x102   :  { %vm187_vm7 = vc.u32 %v957_v60, %v959_v61  ;;  %v186_v15 = vadd.s32 %v959_v61, %v957_v60  ;;  %v866_v60 = vmov 0.0|0.0   ;;  %v637_v61 = vld [vmem:[%s1034_s10] sm:$0x1f] }
 0x103   :  { %v189_v3 = vsel %vm187_vm7, %v188_v0, %v960_v62  ;;  %640 = vperm.xlu1 %826, %v637_v61  }
 0x104   :  { %v190_v4 = vadd.s32 %v189_v3, %v185_v1 }
 0x106   :  { %v191_v5 = vadd.s32 536870912, %v190_v4 }
 0x108   :  { %v192_v6 = vshrl.u32 %v191_v5, 30 }
 0x10a   :  { %v193_v7 = vshll.u32 %v192_v6, 30  ;;  %v216_v30 = vsub.s32 4, %v192_v6 }
 0x10c   :  { %v194_v8 = vsub.s32 %v190_v4, %v193_v7  ;;  %v217_v32 = vsel %vm132_vm9, %v216_v30, %v192_v6  ;;  %v636_v4 = vld [vmem:[%s1033_s9] sm:$0x1f] }
 0x10d   :  { %v219_v33 = vsel %vm131_vm10, 0, %v217_v32 }
 0x10e   :  { %v196_v9 = vsub.s32 0, %v194_v8  ;;  %v223_v34 = vand.u32 3, %v219_v33 }
 0x110   :  { %v733_v10 = vmin.u32 %v196_v9, %v194_v8  ;;  %vm228_vm11 = vcmp.eq.s32.totalorder %v223_v34, 2  ;;  %vm225_vm12 = vcmp.eq.s32.totalorder %v223_v34, 0  ;;  %vm224_vm13 = vcmp.lt.s32.totalorder %v223_v34, 2 }
 0x112   :  { %v198_v11 = vclz %v733_v10 }
 0x114   :  { %v734_v12 = vadd.s32 4294967294, %v198_v11 }
 0x116   :  { %vm735_vm8 = vcmp.lt.s32.totalorder %v734_v12, 0 }
 0x117   :  { %v201_v14 = vsel %vm735_vm8, 0, %v734_v12 }
 0x118   :  { %v202_v16 = vsub.s32 32, %v201_v14  ;;  %v206_v17 = vsub.s32 4294967266, %v201_v14  ;;  %v203_v19 = vshll.u32 %v194_v8, %v201_v14 }
 0x11a   :  { %v204_v20 = vshrl.u32 %v186_v15, %v202_v16  ;;  %v207_v21 = vadd.s32 127, %v206_v17 }
 0x11c   :  { %v205_v22 = vor.u32 %v204_v20, %v203_v19  ;;  %v208_v23 = vshll.u32 %v207_v21, 23 }
 0x11e   :  { %v209_v24 = vor.u32 4788187, %v208_v23  ;;  %v212_v26 = vcvt.s32.f32 %v205_v22 }
 0x120   :  { %v210_v25 = vand.u32 2147483647, %v209_v24 }
 0x122   :  { %v213_v27 = vmul.f32 %v212_v26, %v210_v25 }
 0x124   :  { %v214_v28 = vxor.u32 2147483648, %v213_v27 }
 0x126   :  { %v215_v29 = vsel %vm132_vm9, %v214_v28, %v213_v27 }
 0x127   :  { %v218_v31 = vsel %vm131_vm10, %v950_v13, %v215_v29  ;;  %v382_v13 = vld [vmem:[%s1030_s6] sm:$0xff] }
 0x128   :  { %829 = vcosq.f32 %v218_v31 }
 0x129   :  { %831 = vsinq.f32 %v218_v31 }
 0x132   :  { %v830_v35 = vpop.eup %829 }
 0x133   :  { %v832_v36 = vpop.eup %831  ;;  %v229_v37 = vxor.u32 2147483648, %v830_v35 }
 0x134   :  { %v226_v38 = vxor.u32 2147483648, %v832_v36 }
 0x135   :  { %v230_v39 = vsel %vm228_vm11, %v229_v37, %v832_v36 }
 0x136   :  { %v227_v40 = vsel %vm225_vm12, %v830_v35, %v226_v38 }
 0x137   :  { %v231_v18 = vsel %vm224_vm13, %v227_v40, %v230_v39 }
 0x138   :  { %v232_v43 = vsel %vm222_vm14, nan, %v231_v18 }
 0x139   :  { %770 = vmatpush3.msra.mxu1 %v232_v43  ;;  %775 = vmatpush3.msra.mxu0 %v232_v43 }
 0x13a   :  { %772 = vmatmul.mubr.msk.f32.vlgmr.msra.gmra.mrb[0].mxu1 %vm47_vm0, %v233_v41  ;;  %777 = vmatmul.mubr.msk.f32.vlgmr.msra.gmra.mrb[2].mxu0 %vm47_vm0, %v307_v42 }
 0x13b   :  { %781 = vmatprep.mubr.msk.f32.mxu1 %vm47_vm0, %v382_v13  ;;  %786 = vmatprep.mubr.msk.f32.mxu0 %vm47_vm0, %v465_v44 }
 0x182   :  { %v641_v5 = vpop.permute.xlu1 %640 }
 0x20d   :  { %v303_v45 = vpop.f32.mrb[0].mxu1  ;;  %v377_v46 = vpop.f32.mrb[2].mxu0 }
 0x20e   :  { %v381_v47 = vmul.f32 %v377_v46, %v303_v45  ;;  %v773_v48 = vpop.f32.mrb[1].mxu1  ;;  %v778_v49 = vpop.f32.mrb[3].mxu0 }
 0x210   :  { %779 = vmatprep.subr.mxu1 %v381_v47  ;;  %784 = vmatprep.subr.mxu0 %v381_v47 }
 0x211   :  { %780 = vmatpush3.msra.mxu1 %v381_v47  ;;  %785 = vmatpush3.msra.mxu0 %v381_v47 }
 0x212   :  { %782 = vmatmul.mubr.msk.f32.vlgmr.msra.gmra.mrb[2].mxu1 %vm47_vm0, %v383_v50  ;;  %787 = vmatmul.mubr.msk.f32.vlgmr.msra.gmra.mrb[4].mxu0 %vm47_vm0, %v466_v51 }
 0x213   :  { %800 = vmatprep.mubr.msk.f32.mxu0 %vm858_vm1, %v857_v2  ;;  %793 = vmatprep.mubr.msk.f32.mxu1 %vm552_vm15, %v550_v52  ;;  %v551_v2 = vld [vmem:[%s1032_s8 + $0x8] sm:$0xff]  ;;  %s867_s8 = smov [#allocation2]  }
 0x214   :  { %807 = vmatprep.subr.bf16.mxu0 %v866_v60  ;;  %s723_s18 = sshll.u32 %s867_s8, 4  ;;  %s724_s18 = int_to_ptr.vmem [resolvable:$true] %s723_s18 }
 0x215   :  { %s833_s10 = scalar_lea.vmem %s724_s18, 128  ;;  %p838_p1 = scmp.lt.s32.totalorder %s724_s18, %s724_s18 }
 0x216   :  { %p834_p0 = scmp.ne.s32.totalorder %s724_s18, %s833_s10  ;;  %p839_p2 = scmp.lt.s32.totalorder %s833_s10, %s833_s10 }
 0x218   :  { %p840_p3 = por %p839_p2, %p838_p1 }
 0x21a   :  { %p841_p4 = pnand %p840_p3, %p834_p0 }
 0x2e5   :  { %v783_v53 = vpop.f32.mrb[2].mxu1  ;;  %v788_v54 = vpop.f32.mrb[4].mxu0 }
 0x2e6   :  { %v549_v55 = vmul.f32 %v788_v54, %v783_v53  ;;  %v456_v56 = vpop.f32.mrb[3].mxu1  ;;  %v539_v57 = vpop.f32.mrb[5].mxu0 }
 0x2e7   :  { %v548_v58 = vmul.f32 %v539_v57, %v456_v56 }
 0x2e9   :  { %v803_v59 = vpack.c.bf16 %v549_v55, %v548_v58 }
 0x2eb   :  { %804 = vmatprep.subr.bf16.mxu1 %v803_v59 }
 0x2ec   :  { %806 = vmatpush3.bf16.msra.mxu1 %v803_v59 }
 0x2ef   :  { %794 = vmatmul.mubr.msk.f32.vlgmr.msra.gmra.mrb[4].mxu1 %vm552_vm15, %v551_v2 }
 0x3c2   :  { %v795_v62 = vpop.f32.mrb[4].mxu1 }
 0x3c3   :  { %v635_v63 = vmul.f32 %v795_v62, %v795_v62  ;;  %v625_v0 = vpop.f32.mrb[5].mxu1 }
 0x3c4   :  { %v634_v1 = vmul.f32 %v625_v0, %v625_v0 }
 0x3c6   :  { %v808_v3 = vpack.c.bf16 %v635_v63, %v634_v1 }
 0x3c8   :  { %809 = vmatpush3.bf16.msra.mxu0 %v808_v3 }
 0x3cb   :  { %801 = vmatmul.mubr.msk.f32.vlgmr.msra.gmra.mrb[6].mxu0 %vm552_vm15, %v636_v4 }
 0x49e   :  { %v712_v6 = vpop.f32.mrb[6].mxu0 }
 0x49f   :  { %v713_v7 = vadd.f32 %v712_v6, %v641_v5  ;;  %v802_v8 = vpop.f32.mrb[7].mxu0 }
 0x4a1   :  { %716 = vst [vmem:[#allocation2] sm:$0x1f] %v713_v7 }
 0x4a2   :  { %844 = shalt.err (!%p841_p4)
}
 0x4a3   :  { %s845_s9 = scalar_lea.hbm %s1035_s11, 128 }
 0x4a4   :  { %p846_p5 = scmp.ne.s32.totalorder %s1035_s11, %s845_s9  ;;  %p849_p6 = scmp.lt.u32.totalorder %s845_s9, %s1035_s11 }
 0x4a6   :  { %p851_p7 = pnand %p849_p6, %p846_p5 }
 0x4a8   :  { %854 = shalt.err (!%p851_p7)
}
 0x4a9   :  { %726 = dma.vmem_to_hbm [thread:$0]  %s724_s18, 128, %s1035_s11, [#allocation3]  }
 0x4aa   :  { %855 = dma.done.wait [#allocation3], 128  }
 0x4ab   :  { %856 = vsyncadd [#allocation3], 4294967168 }
 0x4ac   :  { %730 = vsyncpa [#allocation3], 1 }

</bundles_post_ra>
